<compile_context>
chip_gen: v7x
topology: tpu7x:2x2x1
jax: 0.10.0
libtpu: 0.0.40
codegen_flags: <defaults>
</compile_context>

<pallas_src>
import jax
import jax.numpy as jnp
from jax.experimental import pallas as pl
from jax.experimental.pallas import tpu as pltpu


def _round_up(x, m):
    return (x + m - 1) // m * m


def ffn_kernel(x_ref, w1_ref, b1_ref, w2_ref, b2_ref, o_ref, acc_ref):
    # x_ref : (tm, d_model_p)        w1_ref: (d_model_p, tff)   b1_ref: (1, tff)
    # w2_ref: (tff, d_model_p)       b2_ref: (1, d_model_p)
    # o_ref : (tm, d_model_p)        acc_ref: (tm, d_model_p) f32 scratch
    j = pl.program_id(1)

    @pl.when(j == 0)
    def _():
        acc_ref[...] = jnp.zeros_like(acc_ref)

    # First matmul on native-dtype operands (bf16 MXU fast path when bf16),
    # f32 accumulation.
    h = jnp.dot(x_ref[...], w1_ref[...], preferred_element_type=jnp.float32)
    h = jnp.maximum(h + b1_ref[...].astype(jnp.float32), 0.0)  # bias + ReLU
    # dropout: identity (eval / inference mode)
    # TODO(synk): training-mode dropout would use pltpu.prng_seed /
    # pltpu.prng_random_bits to mask `h` here.

    # Partial second matmul over this d_ff slice; accumulate into f32 scratch.
    acc_ref[...] += jnp.dot(h.astype(w2_ref.dtype), w2_ref[...],
                            preferred_element_type=jnp.float32)

    @pl.when(j == pl.num_programs(1) - 1)
    def _():
        o_ref[...] = (acc_ref[...]
                      + b2_ref[...].astype(jnp.float32)).astype(o_ref.dtype)


def position_wise_ffn(x, w1, b1, w2, b2, *, tm=256, tff=512):
    """x: (..., d_model) -> (..., d_model). Weights stored as (in, out)."""
    orig_shape = x.shape
    d_model = x.shape[-1]
    d_ff = w1.shape[1]
    assert w1.shape == (d_model, d_ff) and w2.shape == (d_ff, d_model)

    M = 1
    for s in x.shape[:-1]:
        M *= s
    x2d = x.reshape(M, d_model)

    # ---- lane/sublane-dense padding & tile selection -----------------------
    d_model_p = _round_up(d_model, 128)
    if _round_up(d_ff, 128) <= tff:
        d_ff_p = _round_up(d_ff, 128)
        tff_eff = d_ff_p                       # single d_ff slice
    else:
        d_ff_p = _round_up(d_ff, tff)
        tff_eff = tff
    tm_eff = min(tm, _round_up(M, 8))          # multiple of 8 sublanes
    Mp = _round_up(M, tm_eff)

    x_p = jnp.pad(x2d, ((0, Mp - M), (0, d_model_p - d_model)))
    w1_p = jnp.pad(w1, ((0, d_model_p - d_model), (0, d_ff_p - d_ff)))
    b1_p = jnp.pad(b1.reshape(1, d_ff), ((0, 0), (0, d_ff_p - d_ff)))
    w2_p = jnp.pad(w2, ((0, d_ff_p - d_ff), (0, d_model_p - d_model)))
    b2_p = jnp.pad(b2.reshape(1, d_model), ((0, 0), (0, d_model_p - d_model)))

    grid = (Mp // tm_eff, d_ff_p // tff_eff)   # reduction (d_ff) axis last

    # ---- VMEM budget (double-buffered blocks + f32 accumulator) ------------
    xb = jnp.dtype(x.dtype).itemsize
    wb = jnp.dtype(w1.dtype).itemsize
    est = (2 * (tm_eff * d_model_p * xb         # x tile
                + d_model_p * tff_eff * wb      # w1 slice
                + tff_eff * 4                   # b1
                + tff_eff * d_model_p * wb      # w2 slice
                + d_model_p * 4                 # b2
                + tm_eff * d_model_p * xb)      # out tile
           + tm_eff * d_model_p * 4)            # accumulator scratch
    vmem_limit = int(min(max(2 * est, 32 * 1024 * 1024), 64 * 1024 * 1024))

    cost = pl.CostEstimate(
        flops=2 * M * d_model * d_ff * 2,       # two matmuls
        transcendentals=0,
        bytes_accessed=int(x_p.size * xb + w1_p.size * wb + w2_p.size * wb
                           + b1_p.size * b1_p.dtype.itemsize
                           + b2_p.size * b2_p.dtype.itemsize
                           + Mp * d_model_p * xb),
    )

    out = pl.pallas_call(
        ffn_kernel,
        out_shape=jax.ShapeDtypeStruct((Mp, d_model_p), x.dtype),
        grid_spec=pltpu.PrefetchScalarGridSpec(
            num_scalar_prefetch=0,
            grid=grid,
            in_specs=[
                pl.BlockSpec((tm_eff, d_model_p), lambda i, j: (i, 0)),   # x
                pl.BlockSpec((d_model_p, tff_eff), lambda i, j: (0, j)),  # w1
                pl.BlockSpec((1, tff_eff), lambda i, j: (0, j)),          # b1
                pl.BlockSpec((tff_eff, d_model_p), lambda i, j: (j, 0)),  # w2
                pl.BlockSpec((1, d_model_p), lambda i, j: (0, 0)),        # b2
            ],
            out_specs=pl.BlockSpec((tm_eff, d_model_p), lambda i, j: (i, 0)),
            scratch_shapes=[pltpu.VMEM((tm_eff, d_model_p), jnp.float32)],
        ),
        compiler_params=pltpu.CompilerParams(
            dimension_semantics=("parallel", "arbitrary"),
            vmem_limit_bytes=vmem_limit,
        ),
        cost_estimate=cost,
    )(x_p, w1_p, b1_p, w2_p, b2_p)

    return out[:M, :d_model].reshape(orig_shape)


def init_params(key, d_model, d_ff, dtype=jnp.float32):
    """Deterministic PyTorch-nn.Linear-style init (uniform(-1/sqrt(fan_in), ...))."""
    k1, k2, k3, k4 = jax.random.split(key, 4)
    bound1 = 1.0 / (d_model ** 0.5)
    bound2 = 1.0 / (d_ff ** 0.5)
    # PyTorch Linear stores weight as (out, in); we store (in, out) so the
    # kernel can do x @ w directly — mathematically identical.
    w1 = jax.random.uniform(k1, (d_model, d_ff), dtype, -bound1, bound1)
    b1 = jax.random.uniform(k2, (d_ff,), dtype, -bound1, bound1)
    w2 = jax.random.uniform(k3, (d_ff, d_model), dtype, -bound2, bound2)
    b2 = jax.random.uniform(k4, (d_model,), dtype, -bound2, bound2)
    return w1, b1, w2, b2


if __name__ == "__main__":
    key = jax.random.PRNGKey(0)
    kx, kp = jax.random.split(key)

    # Small but lane-dense shapes (multiples of 128 -> unmasked stores).
    batch, seq, d_model, d_ff = 2, 8, 128, 256
    x = jax.random.normal(kx, (batch, seq, d_model), jnp.float32)
    w1, b1, w2, b2 = init_params(kp, d_model, d_ff)

    y = jax.block_until_ready(position_wise_ffn(x, w1, b1, w2, b2))
    y_ref = jnp.maximum(x @ w1 + b1, 0.0) @ w2 + b2
    assert y.shape == x.shape
    assert jnp.allclose(y, y_ref, atol=1e-4, rtol=1e-4), \
        float(jnp.max(jnp.abs(y - y_ref)))

    # Non-aligned / ragged shapes exercise the padding path.
    d_model2, d_ff2, seq2 = 96, 192, 5
    x2 = jax.random.normal(kx, (batch, seq2, d_model2), jnp.float32)
    w1b, b1b, w2b, b2b = init_params(kp, d_model2, d_ff2)
    y2 = jax.block_until_ready(position_wise_ffn(x2, w1b, b1b, w2b, b2b))
    y2_ref = jnp.maximum(x2 @ w1b + b1b, 0.0) @ w2b + b2b
    assert jnp.allclose(y2, y2_ref, atol=1e-4, rtol=1e-4), \
        float(jnp.max(jnp.abs(y2 - y2_ref)))

    print("KERNEL_OK")
</pallas_src>

<mosaic_0001>
module attributes {stable_mosaic.version = 11 : i64} {
  func.func @ffn_kernel(%arg0: i32, %arg1: i32, %arg2: memref<16x128xf32, #tpu.memory_space<vmem>>, %arg3: memref<128x256xf32, #tpu.memory_space<vmem>>, %arg4: memref<1x256xf32, #tpu.memory_space<vmem>>, %arg5: memref<256x128xf32, #tpu.memory_space<vmem>>, %arg6: memref<1x128xf32, #tpu.memory_space<vmem>>, %arg7: memref<16x128xf32, #tpu.memory_space<vmem>>, %arg8: memref<16x128xf32, #tpu.memory_space<vmem>>) attributes {dimension_semantics = [#tpu.dimension_semantics<parallel>, #tpu.dimension_semantics<arbitrary>], iteration_bounds = array<i64: 1, 1>, scalar_prefetch = 0 : i64, scratch_operands = 1 : i64, tpu.core_type = #tpu.core_type<tc>, window_params = [{transform_indices = @transform_0, window_bounds = array<i64: 16, 128>}, {transform_indices = @transform_1, window_bounds = array<i64: 128, 256>}, {transform_indices = @transform_2, window_bounds = array<i64: 1, 256>}, {transform_indices = @transform_3, window_bounds = array<i64: 256, 128>}, {pipeline_mode = #tpu.pipeline_mode<synchronous>, transform_indices = @transform_4, window_bounds = array<i64: 1, 128>}, {transform_indices = @transform_5, window_bounds = array<i64: 16, 128>}]} {
    %c0_i32 = arith.constant 0 : i32
    %0 = arith.cmpi eq, %arg1, %c0_i32 : i32
    %1 = arith.extui %0 : i1 to i32
    %c0_i32_0 = arith.constant 0 : i32
    %2 = arith.cmpi ne, %1, %c0_i32_0 : i32
    scf.if %2 {
      %cst_16 = arith.constant 0.000000e+00 : f32
      %19 = vector.broadcast %cst_16 : f32 to vector<16x128xf32>
      %c0_17 = arith.constant 0 : index
      %c0_18 = arith.constant 0 : index
      %20 = vector.load %arg8[%c0_17, %c0_18] : memref<16x128xf32, #tpu.memory_space<vmem>>, vector<16x128xf32>
      tpu.vector_store %arg8[%c0_17, %c0_18], %19 {strides = array<i32>} : memref<16x128xf32, #tpu.memory_space<vmem>>, vector<16x128xf32>,
    } else {
    }
    %c0 = arith.constant 0 : index
    %c0_1 = arith.constant 0 : index
    %3 = vector.load %arg2[%c0, %c0_1] : memref<16x128xf32, #tpu.memory_space<vmem>>, vector<16x128xf32>
    %c0_2 = arith.constant 0 : index
    %c0_3 = arith.constant 0 : index
    %4 = vector.load %arg3[%c0_2, %c0_3] : memref<128x256xf32, #tpu.memory_space<vmem>>, vector<128x256xf32>
    %cst = arith.constant dense<0.000000e+00> : vector<16x256xf32>
    %5 = tpu.matmul %3, %4, %cst {dimension_numbers = #tpu.dot_dimension_numbers<[1], [0], [0], [1], [0, 0, 1, 1], [], []>} : vector<16x128xf32>, vector<128x256xf32>, vector<16x256xf32> -> vector<16x256xf32>
    %c0_4 = arith.constant 0 : index
    %c0_5 = arith.constant 0 : index
    %6 = vector.load %arg4[%c0_4, %c0_5] : memref<1x256xf32, #tpu.memory_space<vmem>>, vector<1x256xf32>
    %7 = vector.broadcast %6 : vector<1x256xf32> to vector<16x256xf32>
    %8 = arith.addf %5, %7 : vector<16x256xf32>
    %cst_6 = arith.constant 0.000000e+00 : f32
    %9 = vector.broadcast %cst_6 : f32 to vector<16x256xf32>
    %10 = arith.maximumf %8, %9 : vector<16x256xf32>
    %c0_7 = arith.constant 0 : index
    %c0_8 = arith.constant 0 : index
    %11 = vector.load %arg8[%c0_7, %c0_8] : memref<16x128xf32, #tpu.memory_space<vmem>>, vector<16x128xf32>
    %c0_9 = arith.constant 0 : index
    %c0_10 = arith.constant 0 : index
    %12 = vector.load %arg5[%c0_9, %c0_10] : memref<256x128xf32, #tpu.memory_space<vmem>>, vector<256x128xf32>
    %cst_11 = arith.constant dense<0.000000e+00> : vector<16x128xf32>
    %13 = tpu.matmul %10, %12, %cst_11 {dimension_numbers = #tpu.dot_dimension_numbers<[1], [0], [0], [1], [0, 0, 1, 1], [], []>} : vector<16x256xf32>, vector<256x128xf32>, vector<16x128xf32> -> vector<16x128xf32>
    %14 = arith.addf %11, %13 : vector<16x128xf32>
    %c0_12 = arith.constant 0 : index
    %c0_13 = arith.constant 0 : index
    %15 = vector.load %arg8[%c0_12, %c0_13] : memref<16x128xf32, #tpu.memory_space<vmem>>, vector<16x128xf32>
    tpu.vector_store %arg8[%c0_12, %c0_13], %14 {strides = array<i32>} : memref<16x128xf32, #tpu.memory_space<vmem>>, vector<16x128xf32>,
    %c0_i32_14 = arith.constant 0 : i32
    %16 = arith.cmpi eq, %arg1, %c0_i32_14 : i32
    %17 = arith.extui %16 : i1 to i32
    %c0_i32_15 = arith.constant 0 : i32
    %18 = arith.cmpi ne, %17, %c0_i32_15 : i32
    scf.if %18 {
      %c0_16 = arith.constant 0 : index
      %c0_17 = arith.constant 0 : index
      %19 = vector.load %arg8[%c0_16, %c0_17] : memref<16x128xf32, #tpu.memory_space<vmem>>, vector<16x128xf32>
      %c0_18 = arith.constant 0 : index
      %c0_19 = arith.constant 0 : index
      %20 = vector.load %arg6[%c0_18, %c0_19] : memref<1x128xf32, #tpu.memory_space<vmem>>, vector<1x128xf32>
      %21 = vector.broadcast %20 : vector<1x128xf32> to vector<16x128xf32>
      %22 = arith.addf %19, %21 : vector<16x128xf32>
      %c0_20 = arith.constant 0 : index
      %c0_21 = arith.constant 0 : index
      %23 = vector.load %arg7[%c0_20, %c0_21] : memref<16x128xf32, #tpu.memory_space<vmem>>, vector<16x128xf32>
      tpu.vector_store %arg7[%c0_20, %c0_21], %22 {strides = array<i32>} : memref<16x128xf32, #tpu.memory_space<vmem>>, vector<16x128xf32>,
    } else {
    }
    return
  }
  func.func @transform_0(%arg0: i32, %arg1: i32) -> (i32, i32) {
    %c0_i32 = arith.constant 0 : i32
    %c0_i32_0 = arith.constant 0 : i32
    return %arg0, %c0_i32 : i32, i32
  }
  func.func @transform_1(%arg0: i32, %arg1: i32) -> (i32, i32) {
    %c0_i32 = arith.constant 0 : i32
    %c0_i32_0 = arith.constant 0 : i32
    return %c0_i32, %arg1 : i32, i32
  }
  func.func @transform_2(%arg0: i32, %arg1: i32) -> (i32, i32) {
    %c0_i32 = arith.constant 0 : i32
    %c0_i32_0 = arith.constant 0 : i32
    return %c0_i32, %arg1 : i32, i32
  }
  func.func @transform_3(%arg0: i32, %arg1: i32) -> (i32, i32) {
    %c0_i32 = arith.constant 0 : i32
    %c0_i32_0 = arith.constant 0 : i32
    return %arg1, %c0_i32 : i32, i32
  }
  func.func @transform_4(%arg0: i32, %arg1: i32) -> (i32, i32) {
    %c0_i32 = arith.constant 0 : i32
    %c0_i32_0 = arith.constant 0 : i32
    %c0_i32_1 = arith.constant 0 : i32
    return %c0_i32, %c0_i32_0 : i32, i32
  }
  func.func @transform_5(%arg0: i32, %arg1: i32) -> (i32, i32) {
    %c0_i32 = arith.constant 0 : i32
    %c0_i32_0 = arith.constant 0 : i32
    return %arg0, %c0_i32 : i32, i32
  }
}

</mosaic_0001>

<bundles_post_ra>
// kernel: tpu_custom_call.1
= control target key start
LH: loop header
LB: loop body
LE: loop exit
PB: predicated region body
PF: predicated region fallthrough
CT: control target
= control target key end

     0   :  { %10 = vsyncpa [#allocation4], 0  ;;  %s652_s0 = inlined_call_operand.hbm [shape: f32[16,128], index: 0, kind: input, shape index: {}]   ;;  %s653_s1 = inlined_call_operand.hbm [shape: f32[128,256], index: 1, kind: input, shape index: {}]   ;;  %s654_s2 = inlined_call_operand.vmem [shape: f32[1,256], index: 2, kind: input, shape index: {}]   ;;  %s655_s3 = inlined_call_operand.hbm [shape: f32[256,128], index: 3, kind: input, shape index: {}]   ;;  %s656_s4 = inlined_call_operand.vmem [shape: f32[1,128], index: 4, kind: input, shape index: {}]   ;;  %s657_s5 = inlined_call_operand.hbm [shape: f32[16,128], index: 5, kind: output, shape index: {}]  }
   0x1   :  { %11 = vsyncpa [#allocation7], 0 }
   0x2   :  { %12 = vsyncpa [#allocation5], 0  ;;  %s548_s18 = smov [#allocation6]   ;;  %s454_s22 = scalar_lea.hbm %s653_s1, 4096 }
   0x3   :  { %s30_s19 = sshll.u32 %s548_s18, 4  ;;  %p455_p0 = scmp.ne.s32.totalorder %s653_s1, %s454_s22  ;;  %s31_s19 = int_to_ptr.vmem [resolvable:$true] %s30_s19 }
   0x4   :  { %p458_p1 = scmp.lt.u32.totalorder %s454_s22, %s653_s1 }
   0x6   :  { %p460_p2 = pnand %p458_p1, %p455_p0 }
   0x8   :  { %463 = shalt.err (!%p460_p2)
}
   0x9   :  { %s464_s27 = scalar_lea.vmem %s31_s19, 4096  ;;  %p469_p4 = scmp.lt.s32.totalorder %s31_s19, %s31_s19 }
   0xa   :  { %p465_p3 = scmp.ne.s32.totalorder %s31_s19, %s464_s27  ;;  %p470_p5 = scmp.lt.s32.totalorder %s464_s27, %s464_s27 }
   0xc   :  { %p471_p6 = por %p470_p5, %p469_p4 }
   0xe   :  { %p472_p7 = pnand %p471_p6, %p465_p3 }
  0x10   :  { %475 = shalt.err (!%p472_p7)
}
  0x11   :  { %s549_s28 = smov 256   ;;  %s550_s29 = smov 16  }
  0x12   :  { %36 = dma.hbm_to_vmem [thread:$0]  %s653_s1, 4096, %s31_s19, [#allocation7], %s549_s28, %s549_s28, %s550_s29  }
  0x13   :  { %s551_s7 = smov [#allocation3]   ;;  %s476_s11 = scalar_lea.hbm %s652_s0, 256 }
  0x14   :  { %s18_s8 = sshll.u32 %s551_s7, 4  ;;  %p477_p8 = scmp.ne.s32.totalorder %s652_s0, %s476_s11  ;;  %s19_s8 = int_to_ptr.vmem [resolvable:$true] %s18_s8 }
  0x15   :  { %p480_p9 = scmp.lt.u32.totalorder %s476_s11, %s652_s0 }
  0x17   :  { %p482_p10 = pnand %p480_p9, %p477_p8 }
  0x19   :  { %485 = shalt.err (!%p482_p10)
}
  0x1a   :  { %s486_s16 = scalar_lea.vmem %s19_s8, 256  ;;  %p491_p12 = scmp.lt.s32.totalorder %s19_s8, %s19_s8 }
  0x1b   :  { %p487_p11 = scmp.ne.s32.totalorder %s19_s8, %s486_s16  ;;  %p492_p13 = scmp.lt.s32.totalorder %s486_s16, %s486_s16 }
  0x1d   :  { %p493_p0 = por %p492_p13, %p491_p12 }
  0x1f   :  { %p494_p1 = pnand %p493_p0, %p487_p11 }
  0x21   :  { %497 = shalt.err (!%p494_p1)
}
  0x22   :  { %s552_s1 = smov 128   ;;  %s553_s17 = smov 8  }
  0x23   :  { %24 = dma.hbm_to_vmem [thread:$0]  %s652_s0, 256, %s19_s8, [#allocation4], %s552_s1, %s552_s1, %s553_s17  }
  0x24   :  { %s554_s20 = smov [#allocation8]   ;;  %s498_s24 = scalar_lea.hbm %s655_s3, 4096 }
  0x25   :  { %s44_s21 = sshll.u32 %s554_s20, 4  ;;  %p499_p2 = scmp.ne.s32.totalorder %s655_s3, %s498_s24  ;;  %s45_s21 = int_to_ptr.vmem [resolvable:$true] %s44_s21 }
  0x26   :  { %p502_p3 = scmp.lt.u32.totalorder %s498_s24, %s655_s3 }
  0x28   :  { %p504_p4 = pnand %p502_p3, %p499_p2 }
  0x2a   :  { %507 = shalt.err (!%p504_p4)
}
  0x2b   :  { %s508_s29 = scalar_lea.vmem %s45_s21, 4096  ;;  %p513_p6 = scmp.lt.s32.totalorder %s45_s21, %s45_s21 }
  0x2c   :  { %p509_p5 = scmp.ne.s32.totalorder %s45_s21, %s508_s29  ;;  %p514_p7 = scmp.lt.s32.totalorder %s508_s29, %s508_s29 }
  0x2e   :  { %p515_p8 = por %p514_p7, %p513_p6 }
  0x30   :  { %p516_p9 = pnand %p515_p8, %p509_p5 }
  0x32   :  { %519 = shalt.err (!%p516_p9)
}
  0x33   :  { %50 = dma.hbm_to_vmem [thread:$0]  %s655_s3, 4096, %s45_s21, [#allocation7], %s552_s1, %s552_s1, %s553_s17  }
  0x34   :  { %542 = dma.done.wait [#allocation4], 256  }
  0x35   :  { %543 = vsyncadd [#allocation4], 4294967040 }
  0x36   :  { %544 = dma.done.wait [#allocation7], 8192  }
  0x37   :  { %545 = vsyncadd [#allocation7], 4294959104  ;;  %v555_v0 = vmov 0.0   ;;  %v71_v1 = vld [vmem:[#allocation6 + $0x8] sm:$0xff]  ;;  %v73_v2 = vld [vmem:[#allocation6 + $0x18] sm:$0xff]  ;;  %s556_s8 = smov [#allocation9]  }
  0x38   :  { %178 = vmatprep.mubr.f32.mxu0 %v555_v0  ;;  %v70_v3 = vld [vmem:[#allocation6] sm:$0xff]  ;;  %v381_v4 = vpack.c.bf16 %v73_v2, %v71_v1  ;;  %v72_v5 = vld [vmem:[#allocation6 + $0x10] sm:$0xff]  ;;  %v75_v6 = vld [vmem:[#allocation6 + $0x28] sm:$0xff]  ;;  %s329_s9 = sshll.u32 %s556_s8, 4  ;;  %s330_s9 = int_to_ptr.vmem [resolvable:$true] %s329_s9 }
  0x39   :  { %v77_v7 = vld [vmem:[#allocation6 + $0x38] sm:$0xff]  ;;  %v383_v8 = vpack.c.bf16 %v72_v5, %v70_v3  ;;  %v74_v10 = vld [vmem:[#allocation6 + $0x20] sm:$0xff]  ;;  %v76_v11 = vld [vmem:[#allocation6 + $0x30] sm:$0xff]  ;;  %s520_s10 = scalar_lea.vmem %s330_s9, 256  ;;  %p525_p11 = scmp.lt.s32.totalorder %s330_s9, %s330_s9 }
  0x3a   :  { %v385_v9 = vpack.c.bf16 %v77_v7, %v75_v6  ;;  %v79_v12 = vld [vmem:[#allocation6 + $0x48] sm:$0xff]  ;;  %382 = vmatprep.subr.bf16.mxu0 %v381_v4  ;;  %v81_v13 = vld [vmem:[#allocation6 + $0x58] sm:$0xff]  ;;  %v387_v14 = vpack.c.bf16 %v76_v11, %v74_v10  ;;  %v78_v16 = vld [vmem:[#allocation6 + $0x40] sm:$0xff]  ;;  %p521_p10 = scmp.ne.s32.totalorder %s330_s9, %s520_s10  ;;  %p526_p12 = scmp.lt.s32.totalorder %s520_s10, %s520_s10 }
  0x3b   :  { %384 = vmatpush1.bf16.msra.mxu0 %v383_v8  ;;  %v389_v15 = vpack.c.bf16 %v81_v13, %v79_v12  ;;  %v80_v17 = vld [vmem:[#allocation6 + $0x50] sm:$0xff]  ;;  %v83_v18 = vld [vmem:[#allocation6 + $0x68] sm:$0xff]  ;;  %v85_v19 = vld [vmem:[#allocation6 + $0x78] sm:$0xff] }
  0x3c   :  { %386 = vmatprep.subr.bf16.mxu0 %v385_v9  ;;  %v391_v20 = vpack.c.bf16 %v80_v17, %v78_v16  ;;  %v393_v21 = vpack.c.bf16 %v85_v19, %v83_v18  ;;  %v82_v22 = vld [vmem:[#allocation6 + $0x60] sm:$0xff]  ;;  %v84_v23 = vld [vmem:[#allocation6 + $0x70] sm:$0xff]  ;;  %v87_v24 = vld [vmem:[#allocation6 + $0x88] sm:$0xff]  ;;  %p527_p13 = por %p526_p12, %p525_p11 }
  0x3d   :  { %v89_v25 = vld [vmem:[#allocation6 + $0x98] sm:$0xff]  ;;  %v86_v26 = vld [vmem:[#allocation6 + $0x80] sm:$0xff]  ;;  %v88_v27 = vld [vmem:[#allocation6 + $0x90] sm:$0xff]  ;;  %v395_v30 = vpack.c.bf16 %v84_v23, %v82_v22 }
  0x3e   :  { %v213_v28 = vld [vmem:[#allocation8 + $0x80] sm:$0xff]  ;;  %v214_v29 = vld [vmem:[#allocation8 + $0x88] sm:$0xff]  ;;  %v215_v35 = vld [vmem:[#allocation8 + $0x90] sm:$0xff]  ;;  %v397_v36 = vpack.c.bf16 %v89_v25, %v87_v24  ;;  %v399_v46 = vpack.c.bf16 %v88_v27, %v86_v26  ;;  %p528_p0 = pnand %p527_p13, %p521_p10 }
  0x3f   :  { %388 = vmatpush1.bf16.msra.mxu0 %v387_v14  ;;  %v91_v31 = vld [vmem:[#allocation6 + $0xa8] sm:$0xff]  ;;  %v413_v32 = vpack.c.bf16 %v214_v29, %v213_v28  ;;  %v197_v33 = vld [vmem:[#allocation8] sm:$0xff]  ;;  %v216_v38 = vld [vmem:[#allocation8 + $0x98] sm:$0xff] }
  0x40   :  { %390 = vmatprep.subr.bf16.mxu0 %v389_v15  ;;  %v198_v34 = vld [vmem:[#allocation8 + $0x8] sm:$0xff]  ;;  %v199_v39 = vld [vmem:[#allocation8 + $0x10] sm:$0xff]  ;;  %v200_v40 = vld [vmem:[#allocation8 + $0x18] sm:$0xff]  ;;  %v417_v42 = vpack.c.bf16 %v216_v38, %v215_v35 }
  0x41   :  { %v415_v37 = vpack.c.bf16 %v198_v34, %v197_v33  ;;  %v93_v41 = vld [vmem:[#allocation6 + $0xb8] sm:$0xff]  ;;  %414 = vmatprep.subr.bf16.mxu1 %v413_v32  ;;  %v217_v43 = vld [vmem:[#allocation8 + $0xa0] sm:$0xff]  ;;  %v218_v44 = vld [vmem:[#allocation8 + $0xa8] sm:$0xff]  ;;  %v419_v45 = vpack.c.bf16 %v200_v40, %v199_v39 }
  0x42   :  { %v90_v47 = vld [vmem:[#allocation6 + $0xa0] sm:$0xff]  ;;  %v421_v48 = vpack.c.bf16 %v218_v44, %v217_v43  ;;  %v202_v50 = vld [vmem:[#allocation8 + $0x28] sm:$0xff]  ;;  %v401_v51 = vpack.c.bf16 %v93_v41, %v91_v31  ;;  %v92_v52 = vld [vmem:[#allocation6 + $0xb0] sm:$0xff] }
  0x43   :  { %392 = vmatpush1.bf16.msra.mxu0 %v391_v20  ;;  %416 = vmatpush3.bf16.msra.mxu1 %v415_v37  ;;  %v201_v49 = vld [vmem:[#allocation8 + $0x20] sm:$0xff]  ;;  %v219_v53 = vld [vmem:[#allocation8 + $0xb0] sm:$0xff]  ;;  %v220_v54 = vld [vmem:[#allocation8 + $0xb8] sm:$0xff]  ;;  %v403_v58 = vpack.c.bf16 %v92_v52, %v90_v47 }
  0x44   :  { %394 = vmatprep.subr.bf16.mxu0 %v393_v21  ;;  %418 = vmatprep.subr.bf16.mxu1 %v417_v42  ;;  %v95_v55 = vld [vmem:[#allocation6 + $0xc8] sm:$0xff]  ;;  %v97_v56 = vld [vmem:[#allocation6 + $0xd8] sm:$0xff]  ;;  %v423_v57 = vpack.c.bf16 %v202_v50, %v201_v49  ;;  %v94_v59 = vld [vmem:[#allocation6 + $0xc0] sm:$0xff]  ;;  %v425_v60 = vpack.c.bf16 %v220_v54, %v219_v53 }
  0x45   :  { %v203_v61 = vld [vmem:[#allocation8 + $0x30] sm:$0xff]  ;;  %v204_v62 = vld [vmem:[#allocation8 + $0x38] sm:$0xff]  ;;  %v405_v63 = vpack.c.bf16 %v97_v56, %v95_v55  ;;  %v221_v2 = vld [vmem:[#allocation8 + $0xc0] sm:$0xff] }
  0x46   :  { %v96_v1 = vld [vmem:[#allocation6 + $0xd0] sm:$0xff]  ;;  %v222_v3 = vld [vmem:[#allocation8 + $0xc8] sm:$0xff]  ;;  %v101_v5 = vld [vmem:[#allocation6 + $0xf8] sm:$0xff]  ;;  %v427_v6 = vpack.c.bf16 %v204_v62, %v203_v61 }
  0x47   :  { %396 = vmatpush1.bf16.msra.mxu0 %v395_v30  ;;  %420 = vmatpush3.bf16.msra.mxu1 %v419_v45  ;;  %v99_v4 = vld [vmem:[#allocation6 + $0xe8] sm:$0xff]  ;;  %v407_v7 = vpack.c.bf16 %v96_v1, %v94_v59  ;;  %v98_v8 = vld [vmem:[#allocation6 + $0xe0] sm:$0xff]  ;;  %v429_v9 = vpack.c.bf16 %v222_v3, %v221_v2  ;;  %v100_v13 = vld [vmem:[#allocation6 + $0xf0] sm:$0xff] }
  0x48   :  { %398 = vmatprep.subr.bf16.mxu0 %v397_v36  ;;  %422 = vmatprep.subr.bf16.mxu1 %v421_v48  ;;  %v205_v10 = vld [vmem:[#allocation8 + $0x40] sm:$0xff]  ;;  %v206_v11 = vld [vmem:[#allocation8 + $0x48] sm:$0xff]  ;;  %v409_v12 = vpack.c.bf16 %v101_v5, %v99_v4  ;;  %v223_v14 = vld [vmem:[#allocation8 + $0xd0] sm:$0xff]  ;;  %v411_v17 = vpack.c.bf16 %v100_v13, %v98_v8  ;;  %v104_v36 = vlaneseq }
  0x49   :  { %v224_v15 = vld [vmem:[#allocation8 + $0xd8] sm:$0xff]  ;;  %v431_v16 = vpack.c.bf16 %v206_v11, %v205_v10  ;;  %v207_v19 = vld [vmem:[#allocation8 + $0x50] sm:$0xff]  ;;  %v225_v21 = vld [vmem:[#allocation8 + $0xe0] sm:$0xff] }
  0x4a   :  { %v433_v18 = vpack.c.bf16 %v224_v15, %v223_v14  ;;  %v208_v20 = vld [vmem:[#allocation8 + $0x58] sm:$0xff]  ;;  %v226_v22 = vld [vmem:[#allocation8 + $0xe8] sm:$0xff]  ;;  %v68_v24 = vld [vmem:[#allocation3] sm:$0xff]  ;;  %v105_v37 = vshrl.u32 %v104_v36, 7 }
  0x4b   :  { %400 = vmatpush1.bf16.msra.mxu0 %v399_v46  ;;  %424 = vmatpush3.bf16.msra.mxu1 %v423_v57  ;;  %v435_v23 = vpack.c.bf16 %v208_v20, %v207_v19  ;;  %v437_v25 = vpack.c.bf16 %v226_v22, %v225_v21  ;;  %v69_v26 = vld [vmem:[#allocation3 + $0x8] sm:$0xff]  ;;  %v209_v27 = vld [vmem:[#allocation8 + $0x60] sm:$0xff]  ;;  %v210_v28 = vld [vmem:[#allocation8 + $0x68] sm:$0xff] }
  0x4c   :  { %402 = vmatprep.subr.bf16.mxu0 %v401_v51  ;;  %426 = vmatprep.subr.bf16.mxu1 %v425_v60  ;;  %v439_v29 = vpack.c.bf16 %v210_v28, %v209_v27  ;;  %v227_v30 = vld [vmem:[#allocation8 + $0xf0] sm:$0xff]  ;;  %v228_v31 = vld [vmem:[#allocation8 + $0xf8] sm:$0xff]  ;;  %v106_v38 = vsub.s32 0, %v105_v37  ;;  %v110_v39 = vsub.s32 1, %v105_v37 }
  0x4d   :  { %v441_v32 = vpack.c.bf16 %v228_v31, %v227_v30  ;;  %v211_v33 = vld [vmem:[#allocation8 + $0x70] sm:$0xff]  ;;  %v212_v34 = vld [vmem:[#allocation8 + $0x78] sm:$0xff] }
  0x4e   :  { %v443_v35 = vpack.c.bf16 %v212_v34, %v211_v33  ;;  %v342_v56 = vld [vmem:[%s656_s4] ss:$0 sm:$0xff] }
  0x4f   :  { %404 = vmatpush1.bf16.msra.mxu0 %v403_v58  ;;  %428 = vmatpush3.bf16.msra.mxu1 %v427_v6 }
  0x50   :  { %406 = vmatprep.subr.bf16.mxu0 %v405_v63  ;;  %430 = vmatprep.subr.bf16.mxu1 %v429_v9 }
  0x53   :  { %408 = vmatpush1.bf16.msra.mxu0 %v407_v7  ;;  %432 = vmatpush3.bf16.msra.mxu1 %v431_v16 }
  0x54   :  { %410 = vmatprep.subr.bf16.mxu0 %v409_v12  ;;  %434 = vmatprep.subr.bf16.mxu1 %v433_v18 }
  0x57   :  { %412 = vmatpush1.bf16.msra.mxu0 %v411_v17  ;;  %436 = vmatpush3.bf16.msra.mxu1 %v435_v23 }
  0x58   :  { %438 = vmatprep.subr.bf16.mxu1 %v437_v25 }
  0x5a   :  { %179 = vmatmul.mubr.f32.vlgmr.msra.gmra.mrb[0].mxu0 %v68_v24 }
  0x5b   :  { %184 = vmatprep.mubr.f32.mxu0 %v555_v0  ;;  %440 = vmatpush3.bf16.msra.mxu1 %v439_v29  ;;  %v102_v0 = vld [vmem:[%s654_s2] sm:$0x3] }
  0x5c   :  { %442 = vmatprep.subr.bf16.mxu1 %v441_v32  ;;  %v107_v40 = vrot.slane %v102_v0, %v106_v38  ;;  %v111_v41 = vrot.slane %v102_v0, %v110_v39 }
  0x5e   :  { %185 = vmatmul.mubr.f32.gmra.mrb[2].mxu0 %v69_v26 }
  0x5f   :  { %444 = vmatpush3.bf16.msra.mxu1 %v443_v35 }
 0x12d   :  { %v180_v42 = vpop.f32.mrb[0].mxu0 }
 0x12e   :  { %v181_v43 = vadd.f32 %v180_v42, %v107_v40  ;;  %v182_v44 = vpop.f32.mrb[1].mxu0 }
 0x12f   :  { %v183_v45 = vadd.f32 %v182_v44, %v111_v41 }
 0x130   :  { %v191_v48 = vmax.f32 %v181_v43, 0.0 }
 0x131   :  { %v186_v46 = vpop.f32.mrb[2].mxu0  ;;  %v192_v47 = vmax.f32 %v183_v45, 0.0 }
 0x132   :  { %v187_v49 = vadd.f32 %v186_v46, %v107_v40  ;;  %v188_v50 = vpop.f32.mrb[3].mxu0 }
 0x133   :  { %v189_v51 = vadd.f32 %v188_v50, %v111_v41  ;;  %293 = vmatprep.mubr.f32.mxu1 %v192_v47 }
 0x134   :  { %294 = vmatmul.mubr.f32.vlgmr.msra.gmra.mrb[0].mxu1 %v191_v48  ;;  %v193_v53 = vmax.f32 %v187_v49, 0.0 }
 0x135   :  { %v194_v52 = vmax.f32 %v189_v51, 0.0 }
 0x137   :  { %298 = vmatprep.mubr.f32.mxu1 %v194_v52 }
 0x138   :  { %299 = vmatmul.mubr.f32.gmra.mrb[2].mxu1 %v193_v53 }
 0x207   :  { %v375_v54 = vpop.f32.mrb[0].mxu1 }
 0x208   :  { %v376_v55 = vpop.f32.mrb[1].mxu1 }
 0x209   :  { %v377_v57 = vadd.f32 %v376_v55, %v375_v54 }
 0x20b   :  { %v320_v58 = vadd.f32 %v377_v57, %v342_v56  ;;  %v378_v59 = vpop.f32.mrb[2].mxu1 }
 0x20c   :  { %v379_v60 = vpop.f32.mrb[3].mxu1 }
 0x20d   :  { %322 = vst [vmem:[#allocation9] sm:$0xff] %v320_v58  ;;  %v380_v61 = vadd.f32 %v379_v60, %v378_v59 }
 0x20f   :  { %v321_v62 = vadd.f32 %v380_v61, %v342_v56 }
 0x211   :  { %323 = vst [vmem:[#allocation9 + $0x8] sm:$0xff] %v321_v62 }
 0x212   :  { %531 = shalt.err (!%p528_p0)
}
 0x213   :  { %s532_s12 = scalar_lea.hbm %s657_s5, 256 }
 0x214   :  { %p533_p1 = scmp.ne.s32.totalorder %s657_s5, %s532_s12  ;;  %p536_p2 = scmp.lt.u32.totalorder %s532_s12, %s657_s5 }
 0x216   :  { %p538_p3 = pnand %p536_p2, %p533_p1 }
 0x218   :  { %541 = shalt.err (!%p538_p3)
}
 0x219   :  { %335 = dma.vmem_to_hbm [thread:$0]  %s330_s9, 256, %s657_s5, [#allocation5], %s552_s1, %s552_s1, %s553_s17  }
 0x21a   :  { %546 = dma.done.wait [#allocation5], 256  }
 0x21b   :  { %547 = vsyncadd [#allocation5], 4294967040 }
 0x21c   :  { %339 = vsyncpa [#allocation4], 1 }
 0x21d   :  { %340 = vsyncpa [#allocation7], 1 }
 0x21e   :  { %341 = vsyncpa [#allocation5], 1 }

</bundles_post_ra>
